<compile_context>
chip_gen: v7x
topology: tpu7x:2x2x1
jax: 0.10.0
libtpu: 0.0.40
codegen_flags: <defaults>
</compile_context>

<pallas_src>
import functools
import math

import jax
import jax.numpy as jnp
from jax.experimental import pallas as pl
from jax.experimental.pallas import tpu as pltpu

NEG_SLOPE = 0.01  # nn.LeakyReLU default


def _leaky(x):
    return jnp.where(x >= 0, x, NEG_SLOPE * x)


# ----------------------------------------------------------------------------
# Fused per-layer Pallas kernel
# ----------------------------------------------------------------------------
def _fused_layer_kernel(x_ref, s_ref, wd_ref, bd_ref, wcf_ref, bc_ref,
                        o_ref, xcat_ref, yp_ref, *,
                        H, W, C1, Cm, Cout, deconv_act, conv_act):
    """One full decoder layer for one batch image.

    x_ref   : (1, H*W, C1)        bf16  previous-layer activation (pixel-major)
    s_ref   : (1, H*W, C2)        bf16  skip connection
    wd_ref  : (C1+C2, 4*Cm)       bf16  deconv weight (lanes = kh,kw,Cm)
    bd_ref  : (1, 4*Cm)           f32   deconv bias tiled over the 4 taps
    wcf_ref : (9, 4*Cm, 4*Cout)   bf16  fused 3x3 conv weights per (dh,dw) tap
    bc_ref  : (1, 4*Cout)         f32   conv bias tiled over the 4 parities
    o_ref   : (1, H*(W+2), 4*Cout)      output at padded pitch W+2,
                                        lanes = (a, b, Cout)
    xcat_ref: (H*W, C1+C2)        bf16  VMEM concat staging
    yp_ref  : ((H+2)*(W+2)+2, 4*Cm) bf16 flat halo-padded tap-plane scratch
    """
    HW = H * W
    Wp = W + 2
    K4 = 4 * Cm
    z = jnp.bfloat16

    # ---- zero only the halo ring (+ bottom guard rows) of the persistent
    #      flat scratch; interior cells are fully overwritten below every step.
    yp_ref[pl.ds(0, Wp + 1), :] = jnp.zeros((Wp + 1, K4), z)        # top row + (1,0)
    for r in range(1, H):                                           # side halos, pairwise
        yp_ref[pl.ds((r + 1) * Wp - 1, 2), :] = jnp.zeros((2, K4), z)
    yp_ref[pl.ds((H + 1) * Wp - 1, Wp + 3), :] = jnp.zeros((Wp + 3, K4), z)

    # ---- channel concat in VMEM (no HBM concat) + ONE deconv matmul (K=C1+C2)
    xcat_ref[:, 0:C1] = x_ref[0]
    xcat_ref[:, C1:] = s_ref[0]
    y = (jnp.dot(xcat_ref[...], wd_ref[...], preferred_element_type=jnp.float32)
         + bd_ref[...])                                   # (HW, 4*Cm) f32
    if deconv_act:
        y = _leaky(y)
    y = y.astype(z)                                       # bf16 tap planes

    # ---- stage interior rows into the flat halo-padded scratch (pitch W+2)
    for h in range(H):
        yp_ref[pl.ds((h + 1) * Wp + 1, W), :] = y[h * W:(h + 1) * W, :]

    # ---- Conv2d(3x3, pad=1) over the virtual 2H x 2W image: 9 matmuls whose
    #      LHS are contiguous shifted views of the flat scratch (no copies,
    #      no rolls).  Flat offset dh*(W+2)+dw realizes the (dh, dw) tap.
    acc = jnp.zeros((H * Wp, 4 * Cout), jnp.float32)
    for dh in range(3):
        for dw in range(3):
            slab = yp_ref[pl.ds(dh * Wp + dw, H * Wp), :]      # (H*(W+2), 4*Cm)
            acc = acc + jnp.dot(slab, wcf_ref[dh * 3 + dw],
                                preferred_element_type=jnp.float32)
    acc = acc + bc_ref[...]
    if conv_act:
        acc = _leaky(acc)
    # Single store; junk columns (w >= W) at the padded pitch are dropped by
    # the XLA-side un-interleave.  bf16 for all but the final layer.
    o_ref[0] = acc.astype(o_ref.dtype)


# ----------------------------------------------------------------------------
# Layer wrapper
# ----------------------------------------------------------------------------
def fused_decoder_layer(x_nhwc, skip_nhwc, lp):
    N, H, W, C1 = x_nhwc.shape
    C2 = skip_nhwc.shape[-1]
    Cm, Cout = lp['Cm'], lp['Cout']
    HW, Wp = H * W, W + 2
    out_dtype = lp['out_dtype']

    x2 = x_nhwc.reshape(N, HW, C1).astype(jnp.bfloat16)      # free reshapes
    s2 = skip_nhwc.reshape(N, HW, C2).astype(jnp.bfloat16)

    kernel = functools.partial(
        _fused_layer_kernel, H=H, W=W, C1=C1, Cm=Cm, Cout=Cout,
        deconv_act=lp['deconv_act'], conv_act=lp['conv_act'])

    # grid=(N,) keeps >=2 parallel steps at N=2 (v7x's two TCs split the
    # batch).  TODO(synk): for larger N / realistic H,W add image batching per
    # step and an HW row-band axis with vmem_limit_bytes, per review.
    o = pl.pallas_call(
        kernel,
        out_shape=jax.ShapeDtypeStruct((N, H * Wp, 4 * Cout), out_dtype),
        grid=(N,),
        in_specs=[
            pl.BlockSpec((1, HW, C1), lambda n: (n, 0, 0)),
            pl.BlockSpec((1, HW, C2), lambda n: (n, 0, 0)),
            pl.BlockSpec((C1 + C2, 4 * Cm), lambda n: (0, 0)),
            pl.BlockSpec((1, 4 * Cm), lambda n: (0, 0)),
            pl.BlockSpec((9, 4 * Cm, 4 * Cout), lambda n: (0, 0, 0)),
            pl.BlockSpec((1, 4 * Cout), lambda n: (0, 0)),
        ],
        out_specs=pl.BlockSpec((1, H * Wp, 4 * Cout), lambda n: (n, 0, 0)),
        scratch_shapes=[
            pltpu.VMEM((HW, C1 + C2), jnp.bfloat16),
            pltpu.VMEM(((H + 2) * Wp + 2, 4 * Cm), jnp.bfloat16),
        ],
        compiler_params=pltpu.CompilerParams(
            dimension_semantics=("parallel",)),
    )(x2, s2, lp['wd'], lp['bd4'], lp['wcf'], lp['bc4'])

    # Parity un-interleave + pitch trim (small, bf16 for non-final layers):
    # (N, H*(W+2), (a,b,Cout)) -> (N, 2H, 2W, Cout)
    o = o.reshape(N, H, Wp, 2, 2, Cout)[:, :, :W]
    o = jnp.transpose(o, (0, 1, 3, 2, 4, 5)).reshape(N, 2 * H, 2 * W, Cout)
    return o


# ----------------------------------------------------------------------------
# DecoderNet: config, parameter init, offline weight repack, forward
# ----------------------------------------------------------------------------
SAMPLE_NETS = [
    {'dconv1': [32, 16, 2, 2, 0], 'conv1':     [16, 16, 3, 1, 1]},
    {'dconv2': [32, 16, 2, 2, 0], 'conv2_end': [16,  8, 3, 1, 1]},
]
SUB_NETS = [None, None]
# TODO(synk): sub_nets are arbitrary external nn.Modules passed into __init__;
# they are None in this synthetic config, so no sub_net compute is emitted.


def init_params(key, sample_nets):
    """Synthetic weights, layout (kH, kW, Cin, Cout) for both conv kinds.
    NOTE: a loader for real PyTorch weights must transpose ConvTranspose2d's
    (Cin, Cout, kH, kW) and Conv2d's (Cout, Cin, kH, kW) into this layout."""
    params = []
    for block in sample_nets:
        p = {}
        for name, (cin, cout, k, s, pad) in block.items():
            key, kw_, kb_ = jax.random.split(key, 3)
            bound = 1.0 / math.sqrt(cin * k * k)
            w = jax.random.uniform(kw_, (k, k, cin, cout), jnp.float32, -bound, bound)
            b = jax.random.uniform(kb_, (1, cout), jnp.float32, -bound, bound)
            if 'dconv' in name:
                assert k == 2 and s == 2 and pad == 0
                p['dconv_w'], p['dconv_b'] = w, b
                p['dconv_act'] = ('end' not in name)
            else:
                assert k == 3 and s == 1 and pad == 1
                p['conv_w'], p['conv_b'] = w, b
                p['conv_act'] = ('end' not in name)
        params.append(p)
    return params


def pack_params(raw_params):
    """Offline repack of raw weights into the fused-kernel layout."""
    packed = []
    n_layers = len(raw_params)
    for li, p in enumerate(raw_params):
        wd = p['dconv_w']                              # (2, 2, Cin, Cm)
        Cin, Cm = wd.shape[2], wd.shape[3]
        wd_mat = wd.transpose(2, 0, 1, 3).reshape(Cin, 4 * Cm)   # cols = (kh,kw,Cm)
        bd4 = jnp.tile(p['dconv_b'], (1, 4))           # (1, 4*Cm)

        wc = p['conv_w']                               # (3, 3, Cm, Cout)
        Cout = wc.shape[-1]
        # Fuse 3x3 conv taps into the tap-plane domain:
        # wcf[(dh, dw), (k=2kh+kw, ci), (parity=2a+b, co)]
        wcf = jnp.zeros((3, 3, 4, Cm, 4, Cout), jnp.float32)
        for a in range(2):
            for b in range(2):
                for dy in (-1, 0, 1):
                    for dx in (-1, 0, 1):
                        sh, kh = divmod(a + dy, 2)     # grid shift / tap row
                        sw, kw = divmod(b + dx, 2)     # grid shift / tap col
                        wcf = wcf.at[sh + 1, sw + 1, 2 * kh + kw, :,
                                     2 * a + b, :].add(wc[dy + 1, dx + 1])
        wcf = wcf.reshape(9, 4 * Cm, 4 * Cout)
        bc4 = jnp.tile(p['conv_b'], (1, 4))            # (1, 4*Cout)

        packed.append(dict(
            wd=wd_mat.astype(jnp.bfloat16),
            bd4=bd4.astype(jnp.float32),
            wcf=wcf.astype(jnp.bfloat16),
            bc4=bc4.astype(jnp.float32),
            Cm=Cm, Cout=Cout,
            out_dtype=(jnp.float32 if li == n_layers - 1 else jnp.bfloat16),
            deconv_act=p['dconv_act'], conv_act=p['conv_act']))
    return packed


def decoder_forward(packed_params, temp_nchw):
    """temp_nchw: list of NCHW feature maps, consumed like the PyTorch forward."""
    temp = list(temp_nchw)
    x = jnp.transpose(temp.pop(), (0, 2, 3, 1))        # NCHW -> NHWC
    for lp in packed_params:
        skip = jnp.transpose(temp.pop(), (0, 2, 3, 1))
        x = fused_decoder_layer(x, skip, lp)           # cat+deconv+act+conv[+act]
        # sub_net is None -> no-op
    return jnp.transpose(x, (0, 3, 1, 2))              # NHWC -> NCHW


# ----------------------------------------------------------------------------
# Pure-JAX reference (mirrors the kernel's bf16 boundaries) for self-check
# ----------------------------------------------------------------------------
def _reference_forward(raw_params, temp_nchw):
    temp = list(temp_nchw)
    x = jnp.transpose(temp.pop(), (0, 2, 3, 1))
    for p in raw_params:
        skip = jnp.transpose(temp.pop(), (0, 2, 3, 1))
        x = jnp.concatenate([x, skip], axis=-1).astype(jnp.bfloat16)
        N, H, W, _ = x.shape
        wd = p['dconv_w'].astype(jnp.bfloat16)
        Cm = wd.shape[-1]
        y = jnp.einsum('nhwc,uvcm->nhwuvm', x, wd,
                       preferred_element_type=jnp.float32) + p['dconv_b'][0]
        if p['dconv_act']:
            y = _leaky(y)
        u = jnp.transpose(y, (0, 1, 3, 2, 4, 5)).reshape(N, 2 * H, 2 * W, Cm)
        u = u.astype(jnp.bfloat16)
        up = jnp.pad(u, ((0, 0), (1, 1), (1, 1), (0, 0)))
        wc = p['conv_w'].astype(jnp.bfloat16)
        Cout = wc.shape[-1]
        acc = jnp.zeros((N, 2 * H, 2 * W, Cout), jnp.float32)
        for ky in range(3):
            for kx in range(3):
                acc = acc + jnp.einsum(
                    'nhwc,co->nhwo', up[:, ky:ky + 2 * H, kx:kx + 2 * W, :],
                    wc[ky, kx], preferred_element_type=jnp.float32)
        acc = acc + p['conv_b'][0]
        if p['conv_act']:
            acc = _leaky(acc)
        x = acc
    return jnp.transpose(x, (0, 3, 1, 2))


# ----------------------------------------------------------------------------
if __name__ == "__main__":
    key = jax.random.PRNGKey(0)
    key, k1, k2, k3, kp = jax.random.split(key, 5)

    # Skip-connection stack (encoder outputs), NCHW. forward pops from the end.
    f1 = jax.random.normal(k1, (2, 16, 4, 4), jnp.float32)   # deepest feature (popped first)
    f2 = jax.random.normal(k2, (2, 16, 4, 4), jnp.float32)
    f3 = jax.random.normal(k3, (2, 16, 8, 8), jnp.float32)
    temp = [f3, f2, f1]

    raw_params = init_params(kp, SAMPLE_NETS)
    packed = pack_params(raw_params)

    out = decoder_forward(packed, temp)
    out = jax.block_until_ready(out)

    assert out.shape == (2, 8, 16, 16), out.shape
    assert bool(jnp.all(jnp.isfinite(out)))

    ref = _reference_forward(raw_params, temp)
    assert bool(jnp.allclose(out, ref, atol=3e-2, rtol=3e-2)), \
        float(jnp.max(jnp.abs(out - ref)))

    print("KERNEL_OK")
</pallas_src>

<mosaic_0001>
module attributes {stable_mosaic.version = 11 : i64} {
  func.func @_fused_layer_kernel(%arg0: i32, %arg1: memref<1x16x16xbf16, #tpu.memory_space<vmem>>, %arg2: memref<1x16x16xbf16, #tpu.memory_space<vmem>>, %arg3: memref<32x64xbf16, #tpu.memory_space<vmem>>, %arg4: memref<1x64xf32, #tpu.memory_space<vmem>>, %arg5: memref<9x64x64xbf16, #tpu.memory_space<vmem>>, %arg6: memref<1x64xf32, #tpu.memory_space<vmem>>, %arg7: memref<1x24x64xbf16, #tpu.memory_space<vmem>>, %arg8: memref<16x32xbf16, #tpu.memory_space<vmem>>, %arg9: memref<38x64xbf16, #tpu.memory_space<vmem>>) attributes {dimension_semantics = [#tpu.dimension_semantics<parallel>], iteration_bounds = array<i64: 2>, scalar_prefetch = 0 : i64, scratch_operands = 2 : i64, tpu.core_type = #tpu.core_type<tc>, window_params = [{transform_indices = @transform_0, window_bounds = array<i64: 1, 16, 16>}, {transform_indices = @transform_1, window_bounds = array<i64: 1, 16, 16>}, {pipeline_mode = #tpu.pipeline_mode<synchronous>, transform_indices = @transform_2, window_bounds = array<i64: 32, 64>}, {pipeline_mode = #tpu.pipeline_mode<synchronous>, transform_indices = @transform_3, window_bounds = array<i64: 1, 64>}, {pipeline_mode = #tpu.pipeline_mode<synchronous>, transform_indices = @transform_4, window_bounds = array<i64: 9, 64, 64>}, {pipeline_mode = #tpu.pipeline_mode<synchronous>, transform_indices = @transform_5, window_bounds = array<i64: 1, 64>}, {transform_indices = @transform_6, window_bounds = array<i64: 1, 24, 64>}]} {
    %cst = arith.constant 0.000000e+00 : bf16
    %0 = vector.broadcast %cst : bf16 to vector<7x64xbf16>
    %c0 = arith.constant 0 : index
    %c0_0 = arith.constant 0 : index
    %1 = vector.load %arg9[%c0, %c0_0] : memref<38x64xbf16, #tpu.memory_space<vmem>>, vector<7x64xbf16>
    tpu.vector_store %arg9[%c0, %c0_0], %0 {strides = array<i32>} : memref<38x64xbf16, #tpu.memory_space<vmem>>, vector<7x64xbf16>,
    %cst_1 = arith.constant 0.000000e+00 : bf16
    %2 = vector.broadcast %cst_1 : bf16 to vector<2x64xbf16>
    %c11 = arith.constant 11 : index
    %c0_2 = arith.constant 0 : index
    %3 = vector.load %arg9[%c11, %c0_2] : memref<38x64xbf16, #tpu.memory_space<vmem>>, vector<2x64xbf16>
    tpu.vector_store %arg9[%c11, %c0_2], %2 {strides = array<i32>} : memref<38x64xbf16, #tpu.memory_space<vmem>>, vector<2x64xbf16>,
    %cst_3 = arith.constant 0.000000e+00 : bf16
    %4 = vector.broadcast %cst_3 : bf16 to vector<2x64xbf16>
    %c17 = arith.constant 17 : index
    %c0_4 = arith.constant 0 : index
    %5 = vector.load %arg9[%c17, %c0_4] : memref<38x64xbf16, #tpu.memory_space<vmem>>, vector<2x64xbf16>
    tpu.vector_store %arg9[%c17, %c0_4], %4 {strides = array<i32>} : memref<38x64xbf16, #tpu.memory_space<vmem>>, vector<2x64xbf16>,
    %cst_5 = arith.constant 0.000000e+00 : bf16
    %6 = vector.broadcast %cst_5 : bf16 to vector<2x64xbf16>
    %c23 = arith.constant 23 : index
    %c0_6 = arith.constant 0 : index
    %7 = vector.load %arg9[%c23, %c0_6] : memref<38x64xbf16, #tpu.memory_space<vmem>>, vector<2x64xbf16>
    tpu.vector_store %arg9[%c23, %c0_6], %6 {strides = array<i32>} : memref<38x64xbf16, #tpu.memory_space<vmem>>, vector<2x64xbf16>,
    %cst_7 = arith.constant 0.000000e+00 : bf16
    %8 = vector.broadcast %cst_7 : bf16 to vector<9x64xbf16>
    %c29 = arith.constant 29 : index
    %c0_8 = arith.constant 0 : index
    %9 = vector.load %arg9[%c29, %c0_8] : memref<38x64xbf16, #tpu.memory_space<vmem>>, vector<9x64xbf16>
    tpu.vector_store %arg9[%c29, %c0_8], %8 {strides = array<i32>} : memref<38x64xbf16, #tpu.memory_space<vmem>>, vector<9x64xbf16>,
    %c0_9 = arith.constant 0 : index
    %c0_10 = arith.constant 0 : index
    %c0_11 = arith.constant 0 : index
    %10 = vector.load %arg1[%c0_9, %c0_10, %c0_11] : memref<1x16x16xbf16, #tpu.memory_space<vmem>>, vector<1x16x16xbf16>
    %11 = vector.shape_cast %10 : vector<1x16x16xbf16> to vector<16x16xbf16>
    %c0_12 = arith.constant 0 : index
    %c0_13 = arith.constant 0 : index
    %12 = vector.load %arg8[%c0_12, %c0_13] : memref<16x32xbf16, #tpu.memory_space<vmem>>, vector<16x16xbf16>
    tpu.vector_store %arg8[%c0_12, %c0_13], %11 {strides = array<i32>} : memref<16x32xbf16, #tpu.memory_space<vmem>>, vector<16x16xbf16>,
    %c0_14 = arith.constant 0 : index
    %c0_15 = arith.constant 0 : index
    %c0_16 = arith.constant 0 : index
    %13 = vector.load %arg2[%c0_14, %c0_15, %c0_16] : memref<1x16x16xbf16, #tpu.memory_space<vmem>>, vector<1x16x16xbf16>
    %14 = vector.shape_cast %13 : vector<1x16x16xbf16> to vector<16x16xbf16>
    %c0_17 = arith.constant 0 : index
    %c16 = arith.constant 16 : index
    %15 = vector.load %arg8[%c0_17, %c16] : memref<16x32xbf16, #tpu.memory_space<vmem>>, vector<16x16xbf16>
    tpu.vector_store %arg8[%c0_17, %c16], %14 {strides = array<i32>} : memref<16x32xbf16, #tpu.memory_space<vmem>>, vector<16x16xbf16>,
    %c0_18 = arith.constant 0 : index
    %c0_19 = arith.constant 0 : index
    %16 = vector.load %arg8[%c0_18, %c0_19] : memref<16x32xbf16, #tpu.memory_space<vmem>>, vector<16x32xbf16>
    %c0_20 = arith.constant 0 : index
    %c0_21 = arith.constant 0 : index
    %17 = vector.load %arg3[%c0_20, %c0_21] : memref<32x64xbf16, #tpu.memory_space<vmem>>, vector<32x64xbf16>
    %cst_22 = arith.constant dense<0.000000e+00> : vector<16x64xf32>
    %18 = tpu.matmul %16, %17, %cst_22 {dimension_numbers = #tpu.dot_dimension_numbers<[1], [0], [0], [1], [0, 0, 1, 1], [], []>} : vector<16x32xbf16>, vector<32x64xbf16>, vector<16x64xf32> -> vector<16x64xf32>
    %c0_23 = arith.constant 0 : index
    %c0_24 = arith.constant 0 : index
    %19 = vector.load %arg4[%c0_23, %c0_24] : memref<1x64xf32, #tpu.memory_space<vmem>>, vector<1x64xf32>
    %20 = vector.broadcast %19 : vector<1x64xf32> to vector<16x64xf32>
    %21 = arith.addf %18, %20 : vector<16x64xf32>
    %cst_25 = arith.constant 0.000000e+00 : f32
    %22 = vector.broadcast %cst_25 : f32 to vector<16x64xf32>
    %23 = arith.cmpf oge, %21, %22 : vector<16x64xf32>
    %cst_26 = arith.constant 0.00999999977 : f32
    %24 = vector.broadcast %cst_26 : f32 to vector<16x64xf32>
    %25 = arith.mulf %24, %21 : vector<16x64xf32>
    %26 = arith.select %23, %21, %25 : vector<16x64xi1>, vector<16x64xf32>
    %27 = arith.truncf %26 : vector<16x64xf32> to vector<16x64xbf16>
    %28 = vector.extract_strided_slice %27 {offsets = [0, 0], sizes = [4, 64], strides = [1, 1]} : vector<16x64xbf16> to vector<4x64xbf16>
    %c7 = arith.constant 7 : index
    %c0_27 = arith.constant 0 : index
    %29 = vector.load %arg9[%c7, %c0_27] : memref<38x64xbf16, #tpu.memory_space<vmem>>, vector<4x64xbf16>
    tpu.vector_store %arg9[%c7, %c0_27], %28 {strides = array<i32>} : memref<38x64xbf16, #tpu.memory_space<vmem>>, vector<4x64xbf16>,
    %30 = vector.extract_strided_slice %27 {offsets = [4, 0], sizes = [4, 64], strides = [1, 1]} : vector<16x64xbf16> to vector<4x64xbf16>
    %c13 = arith.constant 13 : index
    %c0_28 = arith.constant 0 : index
    %31 = vector.load %arg9[%c13, %c0_28] : memref<38x64xbf16, #tpu.memory_space<vmem>>, vector<4x64xbf16>
    tpu.vector_store %arg9[%c13, %c0_28], %30 {strides = array<i32>} : memref<38x64xbf16, #tpu.memory_space<vmem>>, vector<4x64xbf16>,
    %32 = vector.extract_strided_slice %27 {offsets = [8, 0], sizes = [4, 64], strides = [1, 1]} : vector<16x64xbf16> to vector<4x64xbf16>
    %c19 = arith.constant 19 : index
    %c0_29 = arith.constant 0 : index
    %33 = vector.load %arg9[%c19, %c0_29] : memref<38x64xbf16, #tpu.memory_space<vmem>>, vector<4x64xbf16>
    tpu.vector_store %arg9[%c19, %c0_29], %32 {strides = array<i32>} : memref<38x64xbf16, #tpu.memory_space<vmem>>, vector<4x64xbf16>,
    %34 = vector.extract_strided_slice %27 {offsets = [12, 0], sizes = [4, 64], strides = [1, 1]} : vector<16x64xbf16> to vector<4x64xbf16>
    %c25 = arith.constant 25 : index
    %c0_30 = arith.constant 0 : index
    %35 = vector.load %arg9[%c25, %c0_30] : memref<38x64xbf16, #tpu.memory_space<vmem>>, vector<4x64xbf16>
    tpu.vector_store %arg9[%c25, %c0_30], %34 {strides = array<i32>} : memref<38x64xbf16, #tpu.memory_space<vmem>>, vector<4x64xbf16>,
    %cst_31 = arith.constant 0.000000e+00 : f32
    %36 = vector.broadcast %cst_31 : f32 to vector<24x64xf32>
    %c0_32 = arith.constant 0 : index
    %c0_33 = arith.constant 0 : index
    %37 = vector.load %arg9[%c0_32, %c0_33] : memref<38x64xbf16, #tpu.memory_space<vmem>>, vector<24x64xbf16>
    %c0_34 = arith.constant 0 : index
    %c0_35 = arith.constant 0 : index
    %c0_36 = arith.constant 0 : index
    %38 = vector.load %arg5[%c0_34, %c0_35, %c0_36] : memref<9x64x64xbf16, #tpu.memory_space<vmem>>, vector<1x64x64xbf16>
    %39 = vector.shape_cast %38 : vector<1x64x64xbf16> to vector<64x64xbf16>
    %cst_37 = arith.constant dense<0.000000e+00> : vector<24x64xf32>
    %40 = tpu.matmul %37, %39, %cst_37 {dimension_numbers = #tpu.dot_dimension_numbers<[1], [0], [0], [1], [0, 0, 1, 1], [], []>} : vector<24x64xbf16>, vector<64x64xbf16>, vector<24x64xf32> -> vector<24x64xf32>
    %41 = arith.addf %36, %40 : vector<24x64xf32>
    %c1 = arith.constant 1 : index
    %c0_38 = arith.constant 0 : index
    %42 = vector.load %arg9[%c1, %c0_38] : memref<38x64xbf16, #tpu.memory_space<vmem>>, vector<24x64xbf16>
    %c1_39 = arith.constant 1 : index
    %c0_40 = arith.constant 0 : index
    %c0_41 = arith.constant 0 : index
    %43 = vector.load %arg5[%c1_39, %c0_40, %c0_41] : memref<9x64x64xbf16, #tpu.memory_space<vmem>>, vector<1x64x64xbf16>
    %44 = vector.shape_cast %43 : vector<1x64x64xbf16> to vector<64x64xbf16>
    %cst_42 = arith.constant dense<0.000000e+00> : vector<24x64xf32>
    %45 = tpu.matmul %42, %44, %cst_42 {dimension_numbers = #tpu.dot_dimension_numbers<[1], [0], [0], [1], [0, 0, 1, 1], [], []>} : vector<24x64xbf16>, vector<64x64xbf16>, vector<24x64xf32> -> vector<24x64xf32>
    %46 = arith.addf %41, %45 : vector<24x64xf32>
    %c2 = arith.constant 2 : index
    %c0_43 = arith.constant 0 : index
    %47 = vector.load %arg9[%c2, %c0_43] : memref<38x64xbf16, #tpu.memory_space<vmem>>, vector<24x64xbf16>
    %c2_44 = arith.constant 2 : index
    %c0_45 = arith.constant 0 : index
    %c0_46 = arith.constant 0 : index
    %48 = vector.load %arg5[%c2_44, %c0_45, %c0_46] : memref<9x64x64xbf16, #tpu.memory_space<vmem>>, vector<1x64x64xbf16>
    %49 = vector.shape_cast %48 : vector<1x64x64xbf16> to vector<64x64xbf16>
    %cst_47 = arith.constant dense<0.000000e+00> : vector<24x64xf32>
    %50 = tpu.matmul %47, %49, %cst_47 {dimension_numbers = #tpu.dot_dimension_numbers<[1], [0], [0], [1], [0, 0, 1, 1], [], []>} : vector<24x64xbf16>, vector<64x64xbf16>, vector<24x64xf32> -> vector<24x64xf32>
    %51 = arith.addf %46, %50 : vector<24x64xf32>
    %c6 = arith.constant 6 : index
    %c0_48 = arith.constant 0 : index
    %52 = vector.load %arg9[%c6, %c0_48] : memref<38x64xbf16, #tpu.memory_space<vmem>>, vector<24x64xbf16>
    %c3 = arith.constant 3 : index
    %c0_49 = arith.constant 0 : index
    %c0_50 = arith.constant 0 : index
    %53 = vector.load %arg5[%c3, %c0_49, %c0_50] : memref<9x64x64xbf16, #tpu.memory_space<vmem>>, vector<1x64x64xbf16>
    %54 = vector.shape_cast %53 : vector<1x64x64xbf16> to vector<64x64xbf16>
    %cst_51 = arith.constant dense<0.000000e+00> : vector<24x64xf32>
    %55 = tpu.matmul %52, %54, %cst_51 {dimension_numbers = #tpu.dot_dimension_numbers<[1], [0], [0], [1], [0, 0, 1, 1], [], []>} : vector<24x64xbf16>, vector<64x64xbf16>, vector<24x64xf32> -> vector<24x64xf32>
    %56 = arith.addf %51, %55 : vector<24x64xf32>
    %c7_52 = arith.constant 7 : index
    %c0_53 = arith.constant 0 : index
    %57 = vector.load %arg9[%c7_52, %c0_53] : memref<38x64xbf16, #tpu.memory_space<vmem>>, vector<24x64xbf16>
    %c4 = arith.constant 4 : index
    %c0_54 = arith.constant 0 : index
    %c0_55 = arith.constant 0 : index
    %58 = vector.load %arg5[%c4, %c0_54, %c0_55] : memref<9x64x64xbf16, #tpu.memory_space<vmem>>, vector<1x64x64xbf16>
    %59 = vector.shape_cast %58 : vector<1x64x64xbf16> to vector<64x64xbf16>
    %cst_56 = arith.constant dense<0.000000e+00> : vector<24x64xf32>
    %60 = tpu.matmul %57, %59, %cst_56 {dimension_numbers = #tpu.dot_dimension_numbers<[1], [0], [0], [1], [0, 0, 1, 1], [], []>} : vector<24x64xbf16>, vector<64x64xbf16>, vector<24x64xf32> -> vector<24x64xf32>
    %61 = arith.addf %56, %60 : vector<24x64xf32>
    %c8 = arith.constant 8 : index
    %c0_57 = arith.constant 0 : index
    %62 = vector.load %arg9[%c8, %c0_57] : memref<38x64xbf16, #tpu.memory_space<vmem>>, vector<24x64xbf16>
    %c5 = arith.constant 5 : index
    %c0_58 = arith.constant 0 : index
    %c0_59 = arith.constant 0 : index
    %63 = vector.load %arg5[%c5, %c0_58, %c0_59] : memref<9x64x64xbf16, #tpu.memory_space<vmem>>, vector<1x64x64xbf16>
    %64 = vector.shape_cast %63 : vector<1x64x64xbf16> to vector<64x64xbf16>
    %cst_60 = arith.constant dense<0.000000e+00> : vector<24x64xf32>
    %65 = tpu.matmul %62, %64, %cst_60 {dimension_numbers = #tpu.dot_dimension_numbers<[1], [0], [0], [1], [0, 0, 1, 1], [], []>} : vector<24x64xbf16>, vector<64x64xbf16>, vector<24x64xf32> -> vector<24x64xf32>
    %66 = arith.addf %61, %65 : vector<24x64xf32>
    %c12 = arith.constant 12 : index
    %c0_61 = arith.constant 0 : index
    %67 = vector.load %arg9[%c12, %c0_61] : memref<38x64xbf16, #tpu.memory_space<vmem>>, vector<24x64xbf16>
    %c6_62 = arith.constant 6 : index
    %c0_63 = arith.constant 0 : index
    %c0_64 = arith.constant 0 : index
    %68 = vector.load %arg5[%c6_62, %c0_63, %c0_64] : memref<9x64x64xbf16, #tpu.memory_space<vmem>>, vector<1x64x64xbf16>
    %69 = vector.shape_cast %68 : vector<1x64x64xbf16> to vector<64x64xbf16>
    %cst_65 = arith.constant dense<0.000000e+00> : vector<24x64xf32>
    %70 = tpu.matmul %67, %69, %cst_65 {dimension_numbers = #tpu.dot_dimension_numbers<[1], [0], [0], [1], [0, 0, 1, 1], [], []>} : vector<24x64xbf16>, vector<64x64xbf16>, vector<24x64xf32> -> vector<24x64xf32>
    %71 = arith.addf %66, %70 : vector<24x64xf32>
    %c13_66 = arith.constant 13 : index
    %c0_67 = arith.constant 0 : index
    %72 = vector.load %arg9[%c13_66, %c0_67] : memref<38x64xbf16, #tpu.memory_space<vmem>>, vector<24x64xbf16>
    %c7_68 = arith.constant 7 : index
    %c0_69 = arith.constant 0 : index
    %c0_70 = arith.constant 0 : index
    %73 = vector.load %arg5[%c7_68, %c0_69, %c0_70] : memref<9x64x64xbf16, #tpu.memory_space<vmem>>, vector<1x64x64xbf16>
    %74 = vector.shape_cast %73 : vector<1x64x64xbf16> to vector<64x64xbf16>
    %cst_71 = arith.constant dense<0.000000e+00> : vector<24x64xf32>
    %75 = tpu.matmul %72, %74, %cst_71 {dimension_numbers = #tpu.dot_dimension_numbers<[1], [0], [0], [1], [0, 0, 1, 1], [], []>} : vector<24x64xbf16>, vector<64x64xbf16>, vector<24x64xf32> -> vector<24x64xf32>
    %76 = arith.addf %71, %75 : vector<24x64xf32>
    %c14 = arith.constant 14 : index
    %c0_72 = arith.constant 0 : index
    %77 = vector.load %arg9[%c14, %c0_72] : memref<38x64xbf16, #tpu.memory_space<vmem>>, vector<24x64xbf16>
    %c8_73 = arith.constant 8 : index
    %c0_74 = arith.constant 0 : index
    %c0_75 = arith.constant 0 : index
    %78 = vector.load %arg5[%c8_73, %c0_74, %c0_75] : memref<9x64x64xbf16, #tpu.memory_space<vmem>>, vector<1x64x64xbf16>
    %79 = vector.shape_cast %78 : vector<1x64x64xbf16> to vector<64x64xbf16>
    %cst_76 = arith.constant dense<0.000000e+00> : vector<24x64xf32>
    %80 = tpu.matmul %77, %79, %cst_76 {dimension_numbers = #tpu.dot_dimension_numbers<[1], [0], [0], [1], [0, 0, 1, 1], [], []>} : vector<24x64xbf16>, vector<64x64xbf16>, vector<24x64xf32> -> vector<24x64xf32>
    %81 = arith.addf %76, %80 : vector<24x64xf32>
    %c0_77 = arith.constant 0 : index
    %c0_78 = arith.constant 0 : index
    %82 = vector.load %arg6[%c0_77, %c0_78] : memref<1x64xf32, #tpu.memory_space<vmem>>, vector<1x64xf32>
    %83 = vector.broadcast %82 : vector<1x64xf32> to vector<24x64xf32>
    %84 = arith.addf %81, %83 : vector<24x64xf32>
    %cst_79 = arith.constant 0.000000e+00 : f32
    %85 = vector.broadcast %cst_79 : f32 to vector<24x64xf32>
    %86 = arith.cmpf oge, %84, %85 : vector<24x64xf32>
    %cst_80 = arith.constant 0.00999999977 : f32
    %87 = vector.broadcast %cst_80 : f32 to vector<24x64xf32>
    %88 = arith.mulf %87, %84 : vector<24x64xf32>
    %89 = arith.select %86, %84, %88 : vector<24x64xi1>, vector<24x64xf32>
    %90 = arith.truncf %89 : vector<24x64xf32> to vector<24x64xbf16>
    %c0_81 = arith.constant 0 : index
    %c0_82 = arith.constant 0 : index
    %c0_83 = arith.constant 0 : index
    %91 = vector.load %arg7[%c0_81, %c0_82, %c0_83] : memref<1x24x64xbf16, #tpu.memory_space<vmem>>, vector<1x24x64xbf16>
    %92 = vector.shape_cast %91 : vector<1x24x64xbf16> to vector<24x64xbf16>
    %93 = vector.shape_cast %90 : vector<24x64xbf16> to vector<1x24x64xbf16>
    tpu.vector_store %arg7[%c0_81, %c0_82, %c0_83], %93 {strides = array<i32>} : memref<1x24x64xbf16, #tpu.memory_space<vmem>>, vector<1x24x64xbf16>,
    return
  }
  func.func @transform_0(%arg0: i32) -> (i32, i32, i32) {
    %c0_i32 = arith.constant 0 : i32
    %c0_i32_0 = arith.constant 0 : i32
    %c0_i32_1 = arith.constant 0 : i32
    return %arg0, %c0_i32, %c0_i32_0 : i32, i32, i32
  }
  func.func @transform_1(%arg0: i32) -> (i32, i32, i32) {
    %c0_i32 = arith.constant 0 : i32
    %c0_i32_0 = arith.constant 0 : i32
    %c0_i32_1 = arith.constant 0 : i32
    return %arg0, %c0_i32, %c0_i32_0 : i32, i32, i32
  }
  func.func @transform_2(%arg0: i32) -> (i32, i32) {
    %c0_i32 = arith.constant 0 : i32
    %c0_i32_0 = arith.constant 0 : i32
    %c0_i32_1 = arith.constant 0 : i32
    return %c0_i32, %c0_i32_0 : i32, i32
  }
  func.func @transform_3(%arg0: i32) -> (i32, i32) {
    %c0_i32 = arith.constant 0 : i32
    %c0_i32_0 = arith.constant 0 : i32
    %c0_i32_1 = arith.constant 0 : i32
    return %c0_i32, %c0_i32_0 : i32, i32
  }
  func.func @transform_4(%arg0: i32) -> (i32, i32, i32) {
    %c0_i32 = arith.constant 0 : i32
    %c0_i32_0 = arith.constant 0 : i32
    %c0_i32_1 = arith.constant 0 : i32
    %c0_i32_2 = arith.constant 0 : i32
    return %c0_i32, %c0_i32_0, %c0_i32_1 : i32, i32, i32
  }
  func.func @transform_5(%arg0: i32) -> (i32, i32) {
    %c0_i32 = arith.constant 0 : i32
    %c0_i32_0 = arith.constant 0 : i32
    %c0_i32_1 = arith.constant 0 : i32
    return %c0_i32, %c0_i32_0 : i32, i32
  }
  func.func @transform_6(%arg0: i32) -> (i32, i32, i32) {
    %c0_i32 = arith.constant 0 : i32
    %c0_i32_0 = arith.constant 0 : i32
    %c0_i32_1 = arith.constant 0 : i32
    return %arg0, %c0_i32, %c0_i32_0 : i32, i32, i32
  }
}

</mosaic_0001>

<bundles_post_ra>
// kernel: tpu_custom_call.1
= control target key start
LH: loop header
LB: loop body
LE: loop exit
PB: predicated region body
PF: predicated region fallthrough
CT: control target
= control target key end

     0   :  { %s2718_s0 = inlined_call_operand.hbm [shape: bf16[2,16,16], index: 0, kind: input, shape index: {}]   ;;  %s2719_s1 = inlined_call_operand.hbm [shape: bf16[2,16,16], index: 1, kind: input, shape index: {}]   ;;  %s2720_s2 = inlined_call_operand.hbm [shape: bf16[32,64], index: 2, kind: input, shape index: {}]   ;;  %s2721_s3 = inlined_call_operand.vmem [shape: f32[1,64], index: 3, kind: input, shape index: {}]   ;;  %s2722_s4 = inlined_call_operand.hbm [shape: bf16[9,64,64], index: 4, kind: input, shape index: {}]   ;;  %s2723_s5 = inlined_call_operand.vmem [shape: f32[1,64], index: 5, kind: input, shape index: {}]   ;;  %s2724_s6 = inlined_call_operand.hbm [shape: bf16[2,24,64], index: 6, kind: output, shape index: {}]  }
   0x1   :  { %2732 = sst [smem:[#allocation18_spill]] %s2718_s0 }
   0x2   :  { %2733 = sst [smem:[#allocation19_spill]] %s2720_s2 }
   0x3   :  { %2734 = sst [smem:[#allocation20_spill]] %s2722_s4 }
   0x4   :  { %11 = vsyncpa [#allocation5], 0 }
   0x5   :  { %13 = vsyncpa [#allocation5 + $0x1], 0 }
   0x6   :  { %14 = vsyncpa [#allocation8], 0 }
   0x7   :  { %16 = vsyncpa [#allocation8 + $0x1], 0 }
   0x8   :  { %17 = vsyncpa [#allocation11], 0 }
   0x9   :  { %18 = vsyncpa [#allocation6], 0 }
   0xa   :  { %20 = vsyncpa [#allocation6 + $0x1], 0  ;;  %s2284_s21 = smov 0   ;;  %s2286_s22 = smov 0  }
   0xb   :  { %s2288_s23 = smov 0   ;;  %s2290_s24 = smov 0  }
   0xc LB: > { %s2305_s25 = sadd.s32 4294967295, %s2234_s24   ;;  %s1627_s26 = sadd.s32 4294967294, %s2234_s24   ;;  %s2234_s24 = sphi %s2290_s24, %s2770_s24   ;;  %s2230_s23 = sphi %s2288_s23, %s2769_s23   ;;  %s2226_s22 = sphi %s2286_s22, %s2768_s22   ;;  %s2222_s21 = sphi %s2284_s21, %s2767_s21  }
   0xd   : > { %p46_p0 = scmp.ne.s32.totalorder %s2226_s22, %s2222_s21  ;;  %p2725_p1 = scmp.eq.s32.totalorder %s2305_s25, 0 }
   0xe   : > { %p186_p3 = scmp.eq.s32.totalorder %s1627_s26, 1  ;;  %p1628_p5 = scmp.ge.s32.totalorder %s2234_s24, 1 }
   0xf   : > { %p2314_p4 = por %p2725_p1, %p46_p0  ;;  %p193_p7 = scmp.lt.s32.totalorder %s2234_s24, 3 }
  0x10   : > { %p2319_p6 = por %p186_p3, %p46_p0  ;;  %s2236_s30 = smov [#allocation9]  }
  0x11   : > { %s2735_s27 = scalar_select %p2314_p4, 1, 0 }
  0x12   : > { %s2736_s28 = scalar_select %p2319_p6, 1, 0 }
  0x13   : > { %p2324_p8 = pnand %p1628_p5, %p193_p7  ;;  %s205_s7 = sshll.u32 %s2236_s30, 4  ;;  %s2328_s7 = int_to_ptr.vmem [resolvable:$true] %s205_s7 }
  0x14   : > { %s2237_s9 = smov [#allocation10]   ;;  %s2739_s2 = sld [smem:[#allocation19_spill]] }
  0x15   : > { %p1921_p9 = pneg %p2324_p8  ;;  %s221_s10 = sshll.u32 %s2237_s9, 4  ;;  %s2339_s10 = int_to_ptr.vmem [resolvable:$true] %s221_s10 }
  0x17   : > { %p2335_p11 = pnand %p1921_p9, %p2725_p1 }
  0x19   : > { %p2042_p13 = pneg %p2335_p11 }
  0x1a   : > { %s2040_s13 = scalar_lea.hbm %s2739_s2, 256 }
  0x1b   : > { %p2041_p12 = scmp.ne.s32.totalorder %s2739_s2, %s2040_s13  ;;  %p2047_p5 = scmp.lt.u32.totalorder %s2040_s13, %s2739_s2 }
  0x1d   : > { %p2043_p0 = pnand %p2042_p13, %p2041_p12 }
  0x1f   : > { %p2044_p3 = pneg %p2043_p0 }
  0x21   : > { %p2049_p7 = pnand %p2047_p5, %p2044_p3 }
  0x23   : > { %2052 = shalt.err (!%p2049_p7)
}
  0x24   : > { %s2053_s18 = scalar_lea.vmem %s2328_s7, 256  ;;  %p2061_p2 = scmp.lt.s32.totalorder %s2328_s7, %s2328_s7 }
  0x25   : > { %p2054_p9 = scmp.ne.s32.totalorder %s2328_s7, %s2053_s18  ;;  %p2062_p12 = scmp.lt.s32.totalorder %s2053_s18, %s2053_s18 }
  0x27   : > { %p2056_p10 = pnand %p2054_p9, %p2042_p13  ;;  %p2063_p0 = por %p2062_p12, %p2061_p2 }
  0x29   : > { %p2057_p1 = pneg %p2056_p10 }
  0x2b   : > { %p2064_p6 = pnand %p2063_p0, %p2057_p1 }
  0x2d   : > { %2067 = shalt.err (!%p2064_p6)
}
  0x2e   : > { %s2726_s19 = smov 64   ;;  %s2728_s20 = smov 4  }
  0x2f   : > { %1924 = dma.hbm_to_vmem [thread:$0]  (!%p2335_p11), %s2739_s2, 256, %s2328_s7, [#allocation8], %s2726_s19, %s2726_s19, %s2728_s20  }
  0x30   : > { %s2740_s4 = sld [smem:[#allocation20_spill]] }
  0x36   : > { %s2068_s12 = scalar_lea.hbm %s2740_s4, 4608 }
  0x37   : > { %p2069_p1 = scmp.ne.s32.totalorder %s2740_s4, %s2068_s12  ;;  %p2075_p10 = scmp.lt.u32.totalorder %s2068_s12, %s2740_s4 }
  0x39   : > { %p2071_p2 = pnand %p2069_p1, %p2042_p13 }
  0x3b   : > { %p2072_p6 = pneg %p2071_p2 }
  0x3d   : > { %p2077_p3 = pnand %p2075_p10, %p2072_p6 }
  0x3f   : > { %2080 = shalt.err (!%p2077_p3)
}
  0x40   : > { %s2081_s7 = scalar_lea.vmem %s2339_s10, 4608  ;;  %p2089_p12 = scmp.lt.s32.totalorder %s2339_s10, %s2339_s10 }
  0x41   : > { %p2082_p5 = scmp.ne.s32.totalorder %s2339_s10, %s2081_s7  ;;  %p2090_p0 = scmp.lt.s32.totalorder %s2081_s7, %s2081_s7 }
  0x43   : > { %p2084_p7 = pnand %p2082_p5, %p2042_p13  ;;  %p2091_p1 = por %p2090_p0, %p2089_p12 }
  0x45   : > { %p2085_p9 = pneg %p2084_p7 }
  0x47   : > { %p2092_p2 = pnand %p2091_p1, %p2085_p9 }
  0x49   : > { %2095 = shalt.err (!%p2092_p2)
}
  0x4a   : > { %1927 = dma.hbm_to_vmem [thread:$0]  (!%p2335_p11), %s2740_s4, 4608, %s2339_s10, [#allocation11], %s2726_s19, %s2726_s19, %s2728_s20  }
  0x4b   : > { %s2400_s8 = sadd.s32 1, %s2234_s24   ;;  %s33_s26 = sadd.s32 1, %s2230_s23 }
  0x4c   : > { %s30_s30 = ssub.s32 %s2234_s24, %s2400_s8  ;;  %p40_p13 = scmp.ne.s32.totalorder %s2230_s23, %s2226_s22 }
  0x4d   : > { %p31_p6 = scmp.eq.s32.totalorder %s30_s30, 0  ;;  %p41_p10 = scmp.eq.s32.totalorder %s2234_s24, 0 }
  0x4e   : > { %p2741_p3 = scmp.eq.s32.totalorder %s2305_s25, 1  ;;  %p1941_p7 = scmp.lt.s32.totalorder %s2234_s24, 2 }
  0x4f   : > { %s2416_s11 = scalar_select %p31_p6, %s2230_s23, %s33_s26  }
  0x50   : > { %p2410_p5 = por %p2741_p3, %p40_p13  ;;  %p42_p9 = por %p41_p10, %p40_p13 }
  0x51   : > { %s238_s12 = sand.u32 1, %s2230_s23   ;;  %s1725_s10 = sshll.u32 %s2234_s24, 7 }
  0x52   : > { %s2742_s9 = scalar_select %p2410_p5, 1, 0 }
  0x53   : > { %s1632_s13 = sshll.u32 %s238_s12, 3  ;;  %s2743_s0 = sld [smem:[#allocation18_spill]] }
  0x54   : > { %s242_s7 = scalar_lea.vmem [#allocation4], %s1632_s13  ;;  %p2427_p11 = pnand %p1941_p7, %p42_p9 }
  0x55   : > { %s249_s17 = sshll.u32 %s242_s7, 4  ;;  %s2434_s14 = scalar_lea.hbm %s2719_s1, %s1725_s10  ;;  %s2425_s17 = int_to_ptr.vmem [resolvable:$true] %s249_s17 }
  0x56   : > { %s263_s15 = scalar_lea.vmem [#allocation7], %s1632_s13  ;;  %s2438_s20 = scalar_lea.sflag [#allocation5], %s238_s12 }
  0x57   : > { %s2436_s19 = sshll.u32 %s263_s15, 4  ;;  %p2098_p0 = pneg %p2427_p11  ;;  %s2470_s19 = int_to_ptr.vmem [resolvable:$true] %s2436_s19 }
  0x59   : > { %s2423_s16 = scalar_lea.hbm %s2743_s0, %s1725_s10  ;;  %s2101_s26 = scalar_lea.hbm %s2743_s0, 256 }
  0x5a   : > { %s2096_s7 = scalar_lea.hbm %s2423_s16, 128  ;;  %p2102_p13 = scmp.lt.u32.totalorder %s2423_s16, %s2743_s0 }
  0x5b   : > { %p2097_p12 = scmp.ne.s32.totalorder %s2423_s16, %s2096_s7  ;;  %p2103_p6 = scmp.lt.u32.totalorder %s2101_s26, %s2096_s7 }
  0x5c   : > { %p2105_p3 = scmp.lt.u32.totalorder %s2096_s7, %s2423_s16 }
  0x5d   : > { %p2099_p1 = pnand %p2098_p0, %p2097_p12  ;;  %p2104_p10 = por %p2103_p6, %p2102_p13 }
  0x5f   : > { %p2100_p2 = pneg %p2099_p1  ;;  %p2106_p7 = por %p2105_p3, %p2104_p10 }
  0x61   : > { %p2107_p9 = pnand %p2106_p7, %p2100_p2 }
  0x63   : > { %2110 = shalt.err (!%p2107_p9)
}
  0x64   : > { %s2111_s12 = scalar_lea.vmem %s2425_s17, 128  ;;  %s2240_s2 = smov [#allocation4]  }
  0x65   : > { %p2112_p12 = scmp.ne.s32.totalorder %s2425_s17, %s2111_s12  ;;  %s2116_s4 = sshll.u32 %s2240_s2, 4  ;;  %s2117_s4 = int_to_ptr.vmem [resolvable:$false] %s2116_s4 }
  0x66   : > { %s2118_s13 = scalar_lea.vmem %s2117_s4, 256  ;;  %p2119_p4 = scmp.lt.s32.totalorder %s2425_s17, %s2117_s4 }
  0x67   : > { %p2114_p1 = pnand %p2112_p12, %p2098_p0  ;;  %p2120_p13 = scmp.lt.s32.totalorder %s2118_s13, %s2111_s12 }
  0x69   : > { %p2115_p5 = pneg %p2114_p1  ;;  %p2121_p6 = por %p2120_p13, %p2119_p4 }
  0x6b   : > { %p2122_p10 = pnand %p2121_p6, %p2115_p5 }
  0x6d   : > { %2125 = shalt.err (!%p2122_p10)
}
  0x6e   : > { %s2745_s15 = smov 4   ;;  %s2746_s7 = smov 64  }
  0x6f   : > { %1931 = dma.hbm_to_vmem [thread:$0]  (!%p2427_p11), %s2423_s16, 128, %s2425_s17, %s2438_s20, %s2746_s7, %s2746_s7, %s2745_s15  }
  0x70   : > { %s259_s26 = sand.u32 1, %s2234_s24   ;;  %s2126_s10 = scalar_lea.hbm %s2434_s14, 128 }
  0x71   : > { %s2473_s30 = scalar_lea.sflag [#allocation8], %s259_s26  ;;  %p2127_p4 = scmp.ne.s32.totalorder %s2434_s14, %s2126_s10 }
  0x72   : > { %s2131_s4 = scalar_lea.hbm %s2719_s1, 256  ;;  %p2132_p3 = scmp.lt.u32.totalorder %s2434_s14, %s2719_s1 }
  0x73   : > { %p2129_p5 = pnand %p2127_p4, %p2098_p0  ;;  %p2133_p7 = scmp.lt.u32.totalorder %s2131_s4, %s2126_s10 }
  0x74   : > { %p2135_p12 = scmp.lt.u32.totalorder %s2126_s10, %s2434_s14 }
  0x75   : > { %p2130_p2 = pneg %p2129_p5  ;;  %p2134_p9 = por %p2133_p7, %p2132_p3 }
  0x77   : > { %p2136_p1 = por %p2135_p12, %p2134_p9 }
  0x79   : > { %p2137_p13 = pnand %p2136_p1, %p2130_p2 }
  0x7b   : > { %2140 = shalt.err (!%p2137_p13)
}
  0x7c   : > { %s2141_s20 = scalar_lea.vmem %s2470_s19, 128  ;;  %s2241_s16 = smov [#allocation7]  }
  0x7d   : > { %p2142_p6 = scmp.ne.s32.totalorder %s2470_s19, %s2141_s20  ;;  %s2146_s17 = sshll.u32 %s2241_s16, 4  ;;  %s2147_s17 = int_to_ptr.vmem [resolvable:$false] %s2146_s17 }
  0x7e   : > { %s2148_s0 = scalar_lea.vmem %s2147_s17, 256  ;;  %p2149_p5 = scmp.lt.s32.totalorder %s2470_s19, %s2147_s17 }
  0x7f   : > { %p2144_p10 = pnand %p2142_p6, %p2098_p0  ;;  %p2150_p3 = scmp.lt.s32.totalorder %s2148_s0, %s2141_s20 }
  0x81   : > { %p2145_p4 = pneg %p2144_p10  ;;  %p2151_p7 = por %p2150_p3, %p2149_p5 }
  0x83   : > { %p2152_p9 = pnand %p2151_p7, %p2145_p4 }
  0x85   : > { %2155 = shalt.err (!%p2152_p9)
}
  0x86   : > { %1934 = dma.hbm_to_vmem [thread:$0]  (!%p2427_p11), %s2434_s14, 128, %s2470_s19, %s2473_s30, %s2746_s7, %s2746_s7, %s2745_s15  }
  0x87   : > { %282 = sbr.rel (%p2324_p8) target bundleno = 830 (0x33e), region = 44  ;;  %s2505_s26 = sand.u32 (!%p2324_p8), 1, %s2226_s22  }
  0x88   : > { %s1639_s10 = sshll.u32 (!%p2324_p8), %s2505_s26, 3  ;;  %s285_s12 = scalar_lea.sflag (!%p2324_p8), [#allocation5], %s2505_s26 }
  0x89   : > { %s288_s2 = scalar_lea.vmem (!%p2324_p8), [#allocation4], %s1639_s10  ;;  %p2747_p0 = scmp.ne.s32.totalorder (!%p2324_p8), %s2735_s27, 0 }
  0x8e   : > { %2201 = dma.done.wait (%p2747_p0), %s285_s12, 128  }
  0x8f   : > { %2203 = vsyncadd (%p2747_p0), %s285_s12, 4294967168  ;;  %s293_s19 = sand.u32 1, %s2305_s25   ;;  %s297_s29 = scalar_lea.vmem [#allocation7], %s1639_s10 }
  0x90   : > { %s294_s18 = scalar_lea.sflag [#allocation8], %s293_s19 }
  0x91   : > { %2205 = dma.done.wait (%p2747_p0), %s294_s18, 128  }
  0x92   : > { %2207 = vsyncadd (%p2747_p0), %s294_s18, 4294967168  ;;  %p2748_p8 = scmp.eq.s32.totalorder %s2305_s25, 0 }
  0x94   : > { %2209 = dma.done.wait (%p2748_p8), [#allocation8], 256   ;;  %p2749_p11 = pmov %p2748_p8 }
  0x95   : > { %p2750_p2 = pmov %p2748_p8 }
  0x96   : > { %2211 = vsyncadd (%p2749_p11), [#allocation8], 4294967040 }
  0x97   : > { %2213 = dma.done.wait (%p2750_p2), [#allocation11], 4608   ;;  %p2751_p12 = pmov %p2750_p2 }
  0x98   : > { %v2242_v0 = vmov 0.0   ;;  %vm2243_vm0 = vmmov 0   ;;  %vm340_vm1 = vcmask 519168   ;;  %vm341_vm2 = vsmask.f32 3328  ;;  %v1987_v3 = vld [vmem:[%s297_s29] sm:$0xff]  }
  0x99   : > { %2215 = vsyncadd (%p2751_p12), [#allocation11], 4294962688  ;;  %1789 = vmatprep.subr.bf16.mxu0 %v2242_v0  ;;  %1793 = vmatprep.mubr.msk.bf16.mxu0 %vm2243_vm0, %v2242_v0  ;;  %vm346_vm3 = vcmask 518145   ;;  %vm347_vm4 = vsmask.f32 2310  ;;  %vm386_vm5 = vcmask 130048  }
  0x9a   : > { %vm2527_vm6 = vmand %vm340_vm1, %vm341_vm2  ;;  %vm353_vm8 = vsmask.f32 1282  ;;  %vm359_vm9 = vsmask.f32 7950  ;;  %vm365_vm10 = vsmask.f32 256 }
  0x9b   : > { %vm2531_vm7 = vmand %vm346_vm3, %vm347_vm4  ;;  %vm352_vm11 = vcmask 517120   ;;  %v1988_v4 = vld [vmem:[%s288_s2] sm:$0xff]   ;;  %vm358_vm12 = vcmask 519171   ;;  %s2244_s27 = smov 16   ;;  %vm364_vm13 = vcmask 516096   ;;  %vm370_vm14 = vcmask 519170  }
  0x9c   : > { %395 = vrot.lane.b32.xlu0 %v1987_v3, %s2244_s27  ;;  %v1989_v5 = vld [vmem:[#allocation9] sm:$0xff]   ;;  %387 = vst.msk [vmem:[#allocation2] sm:$0xff] %vm386_vm5, %v1988_v4  ;;  %v1990_v6 = vld [vmem:[#allocation9 + $0x8] sm:$0xff]   ;;  %v349_v8 = vld [vmem:[#allocation3 + $0x4] sm:$0x6]  ;;  %vm398_vm5 = vcmask 261248  }
  0x9d   : > { %1790 = vmatpush3.bf16.msra.mxu0 %v1989_v5  ;;  %v343_v7 = vld [vmem:[#allocation3] sm:$0xf]  ;;  %vm354_vm15 = vmand %vm352_vm11, %vm353_vm8  ;;  %vm371_vm0 = vsmask.f32 7946  ;;  %v350_v10 = vsel %vm2531_vm7, 0, %v349_v8  ;;  %v1991_v24 = vld [vmem:[#allocation10] sm:$0xff]  }
  0x9e   : > { %1791 = vmatprep.subr.bf16.mxu0 %v2242_v0  ;;  %v344_v9 = vsel %vm2527_vm6, 0, %v343_v7  ;;  %v355_v11 = vld [vmem:[#allocation3 + $0x8] sm:$0x3]  ;;  %vm2543_vm2 = vmand %vm358_vm12, %vm359_vm9  ;;  %v361_v13 = vld [vmem:[#allocation3 + $0x8] sm:$0x8]  ;;  %vm424_vm6 = vcmask 261120  }
  0x9f   : > { %345 = vst [vmem:[#allocation3] sm:$0xf] %v344_v9  ;;  %351 = vst [vmem:[#allocation3 + $0x4] sm:$0x6] %v350_v10  ;;  %v356_v14 = vsel %vm354_vm15, 0, %v355_v11  ;;  %v362_v15 = vsel %vm2543_vm2, 0, %v361_v13 }
  0xa0   : > { %vm2551_vm3 = vmand %vm364_vm13, %vm365_vm10  ;;  %v367_v17 = vld [vmem:[#allocation3 + $0xc] sm:$0x1]  ;;  %v373_v18 = vld [vmem:[#allocation3 + $0xc] sm:$0xc]  ;;  %357 = vst [vmem:[#allocation3 + $0x8] sm:$0x3] %v356_v14 }
  0xa1   : > { %363 = vst [vmem:[#allocation3 + $0x8] sm:$0x8] %v362_v15  ;;  %v368_v19 = vsel %vm2551_vm3, 0, %v367_v17  ;;  %vm2559_vm4 = vmand %vm370_vm14, %vm371_vm0  ;;  %1792 = vmatpush3.bf16.msra.mxu0 %v1990_v6  ;;  %v1992_v25 = vld [vmem:[#allocation10 + $0x8] sm:$0xff]   ;;  %vm376_vm7 = vcmask 518144   ;;  %v1993_v26 = vld [vmem:[#allocation10 + $0x20] sm:$0xff]  }
  0xa2   : > { %369 = vst [vmem:[#allocation3 + $0xc] sm:$0x1] %v368_v19  ;;  %v374_v21 = vsel %vm2559_vm4, 0, %v373_v18  ;;  %1809 = vmatprep.subr.bf16.mxu0 %v1991_v24  ;;  %v2245_v27 = vmov 0   ;;  %v1994_v28 = vld [vmem:[#allocation10 + $0x10] sm:$0xff]   ;;  %1797 = vmatprep.subr.bf16.mxu1 %v1993_v26  ;;  %v1995_v29 = vld [vmem:[#allocation10 + $0x28] sm:$0xff]  }
  0xa3   : > { %375 = vst [vmem:[#allocation3 + $0xc] sm:$0xc] %v374_v21  ;;  %377 = vst.msk [vmem:[#allocation3 + $0x10] sm:$0x7] %vm376_vm7, %v2245_v27  ;;  %1798 = vmatpush3.bf16.msra.mxu1 %v1993_v26  ;;  %v1996_v30 = vld [vmem:[#allocation10 + $0x18] sm:$0xff]   ;;  %v1997_v31 = vld [vmem:[#allocation10 + $0x30] sm:$0xff]  }
  0xa4   : > { %1799 = vmatprep.subr.bf16.mxu1 %v1995_v29  ;;  %v2566_v32 = vld [vmem:[#allocation10 + $0x60] sm:$0xff]   ;;  %v2001_v33 = vld [vmem:[#allocation10 + $0x38] sm:$0xff]   ;;  %v1645_v35 = vld [vmem:[%s2721_s3] ss:$0 sm:$0xff]  ;;  %vm493_vm10 = vsmask.f32 1280 }
  0xa5   : > { %v2569_v34 = vld [vmem:[#allocation10 + $0x40] sm:$0xff]   ;;  %vm520_vm12 = vcmask 519169   ;;  %vm521_vm13 = vsmask.f32 3334  ;;  %vm532_vm14 = vsmask.f32 2306  ;;  %vm2579_vm15 = vmand %vm352_vm11, %vm493_vm10 }
  0xa6   : > { %v490_v50 = vld [vmem:[#allocation3] sm:$0x8]  ;;  %v503_v51 = vld [vmem:[#allocation3 + $0x4] sm:$0xc]  ;;  %v495_v63 = vld [vmem:[#allocation3 + $0x4] sm:$0x3] }
  0xa7   : > { %1800 = vmatpush3.bf16.msra.mxu1 %v1995_v29  ;;  %v506_v55 = vld [vmem:[#allocation3 + $0x8] sm:$0x1]  ;;  %vm522_vm0 = vmand %vm520_vm12, %vm521_vm13  ;;  %s1905_s4 = smul.u32 12, %s2505_s26  ;;  %p2764_p13 = scmp.ne.s32.totalorder %s2742_s9, 0 }
  0xa8   : > { %1801 = vmatprep.subr.bf16.mxu1 %v1997_v31  ;;  %v523_v7 = vld [vmem:[#allocation3 + $0x8] sm:$0xe]  ;;  %vm533_vm11 = vmand %vm376_vm7, %vm532_vm14  ;;  %vm1266_vm7 = vsmask.f32 5376  ;;  %s1906_s13 = smul.u32 192, %s2305_s25  ;;  %s1499_s25 = scalar_lea.sflag [#allocation6], %s2505_s26 }
  0xa9   : > { %s338_s20 = scalar_lea.vmem [#allocation12], %s1905_s4  ;;  %s2246_s2 = smov [#allocation12]  }
  0xaa   : > { %v534_v11 = vld [vmem:[#allocation3 + $0xc] sm:$0x7]  ;;  %s1512_s16 = sshll.u32 %s338_s20, 4  ;;  %s2670_s10 = scalar_lea.hbm %s2724_s6, %s1906_s13  ;;  %s2673_s16 = int_to_ptr.vmem [resolvable:$true] %s1512_s16 }
  0xab   : > { %1802 = vmatpush3.bf16.msra.mxu1 %v1997_v31  ;;  %s2156_s12 = scalar_lea.vmem %s2673_s16, 192  ;;  %s2160_s19 = sshll.u32 %s2246_s2, 4  ;;  %s2161_s19 = int_to_ptr.vmem [resolvable:$false] %s2160_s19 }
  0xac   : > { %1803 = vmatprep.subr.bf16.mxu1 %v2001_v33  ;;  %p2157_p1 = scmp.ne.s32.totalorder %s2673_s16, %s2156_s12  ;;  %s2162_s18 = scalar_lea.vmem %s2161_s19, 384 }
  0xad   : > { %p2163_p4 = scmp.lt.s32.totalorder %s2673_s16, %s2161_s19  ;;  %p2164_p5 = scmp.lt.s32.totalorder %s2162_s18, %s2156_s12 }
  0xae   : > { %p2158_p6 = pnand %p2157_p1, %p2764_p13 }
  0xaf   : > { %1804 = vmatpush3.bf16.msra.mxu1 %v2001_v33  ;;  %p2165_p3 = por %p2164_p5, %p2163_p4 }
  0xb0   : > { %1821 = vmatprep.subr.bf16.mxu1 %v2569_v34  ;;  %p2159_p10 = pneg %p2158_p6 }
  0xb2   : > { %p2166_p7 = pnand %p2165_p3, %p2159_p10 }
 0x10e   : > { %v396_v22 = vpop.permute.xlu0 %395 }
 0x10f   : > { %399 = vst.msk [vmem:[#allocation2] sm:$0xff] %vm398_vm5, %v396_v22  ;;  %v2002_v22 = vld [vmem:[#allocation10 + $0x68] sm:$0xff]   ;;  %vm754_vm5 = vcmask 1046528  }
 0x116   : > { %v400_v23 = vld [vmem:[#allocation2] sm:$0xff] }
 0x117   : > { %1794 = vmatmul.mubr.msk.bf16.vlgmr.msra.gmra.mrb[0].mxu0 %vm424_vm6, %v400_v23  ;;  %vm954_vm6 = vsmask.f32 4352 }
 0x118   : > { %1810 = vmatpush3.bf16.msra.mxu0 %v1991_v24 }
 0x119   : > { %1811 = vmatprep.subr.bf16.mxu0 %v1992_v25 }
 0x11c   : > { %1812 = vmatpush3.bf16.msra.mxu0 %v1992_v25 }
 0x11d   : > { %1813 = vmatprep.subr.bf16.mxu0 %v1994_v28 }
 0x120   : > { %1814 = vmatpush3.bf16.msra.mxu0 %v1994_v28 }
 0x121   : > { %1815 = vmatprep.subr.bf16.mxu0 %v1996_v30 }
 0x124   : > { %1816 = vmatpush3.bf16.msra.mxu0 %v1996_v30 }
 0x125   : > { %1833 = vmatprep.subr.bf16.mxu0 %v2566_v32 }
 0x1ea   : > { %v462_v36 = vpop.f32.mrb[0].mxu0 }
 0x1eb   : > { %v463_v37 = vadd.f32 %v1645_v35, %v462_v36  ;;  %v1795_v38 = vpop.f32.mrb[1].mxu0 }
 0x1ec   : > { %v465_v39 = vpop.f32.mrb[2].mxu0 }
 0x1ed   : > { %vm469_vm8 = vcmp.ge.f32.partialorder %v463_v37, 0.0  ;;  %v471_v40 = vmul.f32 0.01, %v463_v37  ;;  %v466_v41 = vadd.f32 %v1645_v35, %v465_v39  ;;  %v1796_v42 = vpop.f32.mrb[3].mxu0 }
 0x1ef   : > { %v473_v43 = vsel %vm469_vm8, %v463_v37, %v471_v40  ;;  %vm470_vm9 = vcmp.ge.f32.partialorder %v466_v41, 0.0  ;;  %v472_v44 = vmul.f32 0.01, %v466_v41  ;;  %v2007_v37 = vld [vmem:[#allocation10 + $0x70] sm:$0xff]   ;;  %vm1168_vm8 = vcmask 1045504  }
 0x1f0   : > { %v1727_v45 = vpack.c.bf16 %v473_v43, %v473_v43 }
 0x1f1   : > { %v474_v46 = vsel %vm470_vm9, %v466_v41, %v472_v44 }
 0x1f2   : > { %v480_v47 = vshll.u32 %v1727_v45, 16  ;;  %v483_v48 = vshrl.u32 %v1727_v45, 16  ;;  %v1728_v49 = vpack.c.bf16 %v474_v46, %v474_v46  ;;  %v2009_v46 = vld [vmem:[#allocation10 + $0x48] sm:$0xff]  }
 0x1f4   : > { %v482_v52 = vrot.slane %v480_v47, 5  ;;  %v485_v53 = vrot.slane %v483_v48, 4  ;;  %v498_v54 = vrot.slane %v483_v48, 7  ;;  %v512_v56 = vshrl.u32 %v1728_v49, 16 }
 0x1f5   : > { %v515_v57 = vshll.u32 %v1728_v49, 16 }
 0x1f6   : > { %v486_v58 = vor.u32 %v485_v53, %v482_v52  ;;  %v491_v59 = vsel %vm2543_vm2, %v482_v52, %v490_v50  ;;  %v499_v60 = vor.u32 %v498_v54, %v480_v47  ;;  %v500_v61 = vrot.slane %v498_v54, 4  ;;  %v2010_v47 = vld [vmem:[#allocation10 + $0x78] sm:$0xff]   ;;  %v2011_v50 = vld [vmem:[#allocation10 + $0x50] sm:$0xff]  }
 0x1f7   : > { %492 = vst [vmem:[#allocation3] sm:$0x8] %v491_v59  ;;  %v514_v0 = vrot.slane %v512_v56, 6  ;;  %v517_v1 = vrot.slane %v515_v57, 7  ;;  %v526_v2 = vrot.slane %v512_v56, 5  ;;  %v527_v3 = vrot.slane %v515_v57, 6 }
 0x1f8   : > { %v487_v4 = vrot.slane %v486_v58, 4  ;;  %v504_v5 = vsel %vm2559_vm4, %v499_v60, %v503_v51  ;;  %v507_v6 = vsel %vm2551_vm3, %v500_v61, %v506_v55  ;;  %vm608_vm2 = vcmask 523264   ;;  %v2012_v51 = vld [vmem:[#allocation10 + $0xa0] sm:$0xff]   ;;  %v1253_v57 = vld [vmem:[#allocation3 + $0x10] sm:$0x7] }
 0x1f9   : > { %505 = vst [vmem:[#allocation3 + $0x4] sm:$0xc] %v504_v5  ;;  %508 = vst [vmem:[#allocation3 + $0x8] sm:$0x1] %v507_v6  ;;  %v518_v8 = vor.u32 %v517_v1, %v514_v0  ;;  %v528_v9 = vor.u32 %v527_v3, %v526_v2  ;;  %vm856_vm3 = vcmask 1044480   ;;  %v2015_v58 = vld [vmem:[#allocation10 + $0xa8] sm:$0xff]  }
 0x1fa   : > { %v496_v10 = vsel %vm2579_vm15, %v487_v4, %v495_v63  ;;  %vm568_vm4 = vsmask.f32 7424  ;;  %v2016_v0 = vld [vmem:[#allocation10 + $0x80] sm:$0xff]   ;;  %v2018_v4 = vld [vmem:[#allocation10 + $0xb0] sm:$0xff]  }
 0x1fb   : > { %497 = vst [vmem:[#allocation3 + $0x4] sm:$0x3] %v496_v10  ;;  %v524_v12 = vsel %vm522_vm0, %v518_v8, %v523_v7  ;;  %v529_v13 = vrot.slane %v528_v9, 4  ;;  %v2019_v10 = vld [vmem:[#allocation10 + $0x88] sm:$0xff]  }
 0x1fc   : > { %525 = vst [vmem:[#allocation3 + $0x8] sm:$0xe] %v524_v12 }
 0x1fd   : > { %v535_v14 = vsel %vm533_vm11, %v529_v13, %v534_v11  ;;  %v2020_v11 = vld [vmem:[#allocation10 + $0xb8] sm:$0xff]  }
 0x1fe   : > { %536 = vst [vmem:[#allocation3 + $0xc] sm:$0x7] %v535_v14  ;;  %v537_v15 = vld [vmem:[#allocation3] sm:$0xf] }
 0x1ff   : > { %v839_v17 = vld [vmem:[#allocation3] sm:$0x8] }
 0x200   : > { %v741_v28 = vld [vmem:[#allocation3] sm:$0xe]  ;;  %v1145_v3 = vld [vmem:[#allocation3 + $0x4] sm:$0xc] }
 0x202   : > { %v2593_v16 = vld [vmem:[#allocation3 + $0x4] sm:$0xf] }
 0x203   : > { %v1651_v18 = vcombine.low %v537_v15, %v2593_v16  ;;  %v2596_v19 = vld [vmem:[#allocation3 + $0x8] sm:$0xf]  ;;  %v2599_v20 = vcombine.low %v839_v17, %v2593_v16  ;;  %v1666_v30 = vcombine.low %v741_v28, %v2593_v16  ;;  %v2021_v17 = vld [vmem:[#allocation10 + $0x90] sm:$0xff]  }
 0x204   : > { %v1659_v21 = vcombine.low %v2596_v19, %v2596_v19  ;;  %v1688_v59 = vcombine.low %v2593_v16, %v2596_v19  ;;  %v2633_v62 = vld [vmem:[#allocation3 + $0x8] sm:$0xf] }
 0x205   : > { %1817 = vmatprep.mubr.msk.bf16.mxu0 %vm608_vm2, %v1651_v18  ;;  %v840_v23 = vld [vmem:[#allocation3 + $0xc] sm:$0x7]  ;;  %v572_v27 = vshll.u32 %v1651_v18, 16  ;;  %v857_v29 = vrot.slane %v2599_v20, 3  ;;  %v570_v33 = vshrl.u32 %v1651_v18, 16  ;;  %v755_v45 = vrot.slane %v1666_v30, 1 }
 0x206   : > { %v548_v24 = vld [vmem:[#allocation3 + $0xc] sm:$0x1]  ;;  %1818 = vmatmul.mubr.msk.bf16.vlgmr.msra.gmra.mrb[4].mxu0 %vm608_vm2, %v1659_v21  ;;  %v1674_v25 = vcombine.low %v2596_v19, %v840_v23  ;;  %v956_v54 = vshrl.u32 %v2599_v20, 16  ;;  %v959_v55 = vshll.u32 %v2599_v20, 16  ;;  %v1696_v5 = vcombine.low %v1145_v3, %v2633_v62  ;;  %v2023_v18 = vld [vmem:[#allocation10 + $0xe0] sm:$0xff]   ;;  %v2030_v30 = vld [vmem:[#allocation10 + $0xf0] sm:$0xff]  }
 0x207   : > { %v2607_v26 = vcombine.low %v2596_v19, %v548_v24  ;;  %1834 = vmatpush3.bf16.msra.mxu0 %v2566_v32  ;;  %v574_v35 = vrot.slane %v572_v27, 1  ;;  %v2617_v42 = vld [vmem:[#allocation3 + $0xc] sm:$0xf] }
 0x208   : > { %1835 = vmatprep.subr.bf16.mxu0 %v2002_v22  ;;  %v858_v31 = vrot.slane %v1674_v25, 3  ;;  %v1681_v49 = vcombine.low %v2596_v19, %v2617_v42  ;;  %v2629_v56 = vld [vmem:[#allocation3 + $0xc] sm:$0xf]  ;;  %v958_v1 = vrot.slane %v956_v54, 3  ;;  %v961_v2 = vrot.slane %v959_v55, 4  ;;  %v2026_v25 = vld [vmem:[#allocation10 + $0x98] sm:$0xff]  }
 0x209   : > { %v577_v36 = vshll.u32 %v2607_v26, 16  ;;  %v581_v38 = vshrl.u32 %v2607_v26, 16  ;;  %v575_v40 = vor.u32 %v574_v35, %v570_v33  ;;  %v756_v32 = vrot.slane %v2607_v26, 1  ;;  %v2027_v26 = vld [vmem:[#allocation10 + $0xe8] sm:$0xff]  }
 0x20a   : > { %v859_v39 = vsel %vm856_vm3, %v857_v29, %v858_v31  ;;  %v964_v52 = vshrl.u32 %v1681_v49, 16  ;;  %v967_v53 = vshll.u32 %v1681_v49, 16  ;;  %v2637_v63 = vcombine.low %v2629_v56, %v1253_v57  ;;  %v2028_v29 = vld [vmem:[#allocation10 + $0xc0] sm:$0xff]   ;;  %v2031_v35 = vld [vmem:[#allocation10 + $0xc8] sm:$0xff]  }
 0x20b   : > { %v579_v41 = vrot.slane %v577_v36, 1  ;;  %1836 = vmatpush3.bf16.msra.mxu0 %v2002_v22  ;;  %1841 = vmatprep.mubr.msk.bf16.mxu0 %vm608_vm2, %v859_v39  ;;  %v757_v48 = vsel %vm754_vm5, %v755_v45, %v756_v32  ;;  %v962_v9 = vor.u32 %v961_v2, %v958_v1  ;;  %v1268_v12 = vshrl.u32 %v1696_v5, 16  ;;  %v1148_v22 = vld [vmem:[#allocation3 + $0x10] sm:$0x3]  ;;  %v2032_v36 = vld [vmem:[#allocation10 + $0xf8] sm:$0xff]  }
 0x20c   : > { %1837 = vmatprep.subr.bf16.mxu0 %v2007_v37  ;;  %v966_v60 = vrot.slane %v964_v52, 3  ;;  %v969_v61 = vrot.slane %v967_v53, 4  ;;  %v1276_v7 = vshrl.u32 %v2637_v63, 16  ;;  %v1279_v8 = vshll.u32 %v2637_v63, 16  ;;  %v2034_v39 = vld [vmem:[#allocation10 + $0xd8] sm:$0xff]  }
 0x20d   : > { %v580_v43 = vsel %vm568_vm4, %v575_v40, %v579_v41  ;;  %v583_v44 = vor.u32 %v581_v38, %v579_v41  ;;  %v1271_v13 = vshll.u32 %v1696_v5, 16  ;;  %v1270_v19 = vrot.slane %v1268_v12, 2  ;;  %v2033_v38 = vld [vmem:[#allocation10 + $0xd0] sm:$0xff]   ;;  %v1365_v40 = vld [vmem:[#allocation3 + $0x4] sm:$0x8] }
 0x20e   : > { %1805 = vmatprep.mubr.msk.bf16.mxu1 %vm608_vm2, %v580_v43  ;;  %v970_v6 = vor.u32 %v969_v61, %v966_v60  ;;  %v1278_v15 = vrot.slane %v1276_v7, 2  ;;  %v1281_v16 = vrot.slane %v1279_v8, 3  ;;  %v1689_v23 = vcombine.low %v2617_v42, %v2617_v42  ;;  %v2035_v41 = vld [vmem:[#allocation10 + $0x100] sm:$0xff]  }
 0x20f   : > { %1806 = vmatmul.mubr.msk.bf16.vlgmr.msra.gmra.mrb[0].mxu1 %vm608_vm2, %v583_v44  ;;  %1838 = vmatpush3.bf16.msra.mxu0 %v2007_v37  ;;  %v1273_v20 = vrot.slane %v1271_v13, 3  ;;  %v1697_v27 = vcombine.low %v2629_v56, %v1148_v22  ;;  %v1169_v33 = vrot.slane %v1696_v5, 2  ;;  %v1379_v42 = vrot.slane %v2637_v63, 3  ;;  %v2037_v44 = vld [vmem:[#allocation10 + $0x108] sm:$0xff]  }
 0x210   : > { %1822 = vmatpush3.bf16.msra.mxu1 %v2569_v34  ;;  %1829 = vmatprep.mubr.msk.bf16.mxu1 %vm608_vm2, %v757_v48  ;;  %v2014_v34 = vld [vmem:[#allocation10 + $0x58] sm:$0xff]   ;;  %v971_v14 = vsel %vm954_vm6, %v962_v9, %v970_v6  ;;  %v1282_v21 = vor.u32 %v1281_v16, %v1278_v15 }
 0x211   : > { %1823 = vmatprep.subr.bf16.mxu1 %v2009_v46  ;;  %1839 = vmatprep.subr.bf16.mxu0 %v2010_v47  ;;  %v1274_v24 = vor.u32 %v1273_v20, %v1270_v19 }
 0x213   : > { %1840 = vmatpush3.bf16.msra.mxu0 %v2010_v47  ;;  %v1283_v28 = vsel %vm1266_vm7, %v1274_v24, %v1282_v21  ;;  %v2039_v47 = vld [vmem:[#allocation10 + $0x118] sm:$0xff]  }
 0x214   : > { %1824 = vmatpush3.bf16.msra.mxu1 %v2009_v46  ;;  %1857 = vmatprep.subr.bf16.mxu0 %v2012_v51  ;;  %v2038_v46 = vld [vmem:[#allocation10 + $0x110] sm:$0xff]  }
 0x215   : > { %1825 = vmatprep.subr.bf16.mxu1 %v2011_v50 }
 0x216   : > { %1842 = vmatmul.mubr.msk.bf16.vlgmr.msra.gmra.mrb[8].mxu0 %vm608_vm2, %v858_v31  ;;  %v1170_v31 = vrot.slane %v1697_v27, 2 }
 0x217   : > { %1858 = vmatpush3.bf16.msra.mxu0 %v2012_v51  ;;  %1865 = vmatprep.mubr.msk.bf16.mxu0 %vm608_vm2, %v1688_v59 }
 0x218   : > { %1826 = vmatpush3.bf16.msra.mxu1 %v2011_v50  ;;  %1859 = vmatprep.subr.bf16.mxu0 %v2015_v58  ;;  %v1171_v37 = vsel %vm1168_vm8, %v1169_v33, %v1170_v31 }
 0x219   : > { %1827 = vmatprep.subr.bf16.mxu1 %v2014_v34 }
 0x21b   : > { %1860 = vmatpush3.bf16.msra.mxu0 %v2015_v58 }
 0x21c   : > { %1828 = vmatpush3.bf16.msra.mxu1 %v2014_v34  ;;  %1861 = vmatprep.subr.bf16.mxu0 %v2018_v4 }
 0x21d   : > { %1845 = vmatprep.subr.bf16.mxu1 %v2016_v0 }
 0x21f   : > { %1830 = vmatmul.mubr.msk.bf16.vlgmr.msra.gmra.mrb[4].mxu1 %vm608_vm2, %v756_v32  ;;  %1862 = vmatpush3.bf16.msra.mxu0 %v2018_v4  ;;  %v1711_v32 = vcombine.low %v1365_v40, %v2633_v62 }
 0x220   : > { %1846 = vmatpush3.bf16.msra.mxu1 %v2016_v0  ;;  %1853 = vmatprep.mubr.msk.bf16.mxu1 %vm608_vm2, %v971_v14 }
 0x221   : > { %1847 = vmatprep.subr.bf16.mxu1 %v2019_v10  ;;  %1863 = vmatprep.subr.bf16.mxu0 %v2020_v11  ;;  %v1378_v43 = vrot.slane %v1711_v32, 3 }
 0x223   : > { %1864 = vmatpush3.bf16.msra.mxu0 %v2020_v11  ;;  %v1380_v45 = vsel %vm856_vm3, %v1378_v43, %v1379_v42 }
 0x224   : > { %1848 = vmatpush3.bf16.msra.mxu1 %v2019_v10  ;;  %1881 = vmatprep.subr.bf16.mxu0 %v2023_v18 }
 0x225   : > { %1849 = vmatprep.subr.bf16.mxu1 %v2021_v17 }
 0x226   : > { %1866 = vmatmul.mubr.msk.bf16.vlgmr.msra.gmra.mrb[12].mxu0 %vm608_vm2, %v1689_v23 }
 0x227   : > { %1882 = vmatpush3.bf16.msra.mxu0 %v2023_v18  ;;  %1889 = vmatprep.mubr.msk.bf16.mxu0 %vm608_vm2, %v1283_v28 }
 0x228   : > { %1850 = vmatpush3.bf16.msra.mxu1 %v2021_v17  ;;  %1883 = vmatprep.subr.bf16.mxu0 %v2027_v26 }
 0x229   : > { %1851 = vmatprep.subr.bf16.mxu1 %v2026_v25 }
 0x22b   : > { %1884 = vmatpush3.bf16.msra.mxu0 %v2027_v26 }
 0x22c   : > { %1852 = vmatpush3.bf16.msra.mxu1 %v2026_v25  ;;  %1885 = vmatprep.subr.bf16.mxu0 %v2030_v30 }
 0x22d   : > { %1869 = vmatprep.subr.bf16.mxu1 %v2028_v29 }
 0x22f   : > { %1854 = vmatmul.mubr.msk.bf16.vlgmr.msra.gmra.mrb[8].mxu1 %vm608_vm2, %v970_v6  ;;  %1886 = vmatpush3.bf16.msra.mxu0 %v2030_v30 }
 0x230   : > { %1870 = vmatpush3.bf16.msra.mxu1 %v2028_v29  ;;  %1877 = vmatprep.mubr.msk.bf16.mxu1 %vm608_vm2, %v1171_v37 }
 0x231   : > { %1871 = vmatprep.subr.bf16.mxu1 %v2031_v35  ;;  %1887 = vmatprep.subr.bf16.mxu0 %v2032_v36 }
 0x233   : > { %1888 = vmatpush3.bf16.msra.mxu0 %v2032_v36 }
 0x234   : > { %1872 = vmatpush3.bf16.msra.mxu1 %v2031_v35 }
 0x235   : > { %1873 = vmatprep.subr.bf16.mxu1 %v2033_v38 }
 0x236   : > { %1890 = vmatmul.mubr.msk.bf16.vlgmr.msra.gmra.mrb[16].mxu0 %vm608_vm2, %v1282_v21 }
 0x238   : > { %1874 = vmatpush3.bf16.msra.mxu1 %v2033_v38 }
 0x239   : > { %1875 = vmatprep.subr.bf16.mxu1 %v2034_v39 }
 0x23c   : > { %1876 = vmatpush3.bf16.msra.mxu1 %v2034_v39  ;;  %v1718_v39 = vld [vmem:[%s2723_s5] ss:$0 sm:$0xff] }
 0x23d   : > { %1893 = vmatprep.subr.bf16.mxu1 %v2035_v41 }
 0x23f   : > { %1878 = vmatmul.mubr.msk.bf16.vlgmr.msra.gmra.mrb[12].mxu1 %vm608_vm2, %v1170_v31 }
 0x240   : > { %1894 = vmatpush3.bf16.msra.mxu1 %v2035_v41  ;;  %1901 = vmatprep.mubr.msk.bf16.mxu1 %vm608_vm2, %v1380_v45 }
 0x241   : > { %1895 = vmatprep.subr.bf16.mxu1 %v2037_v44 }
 0x244   : > { %1896 = vmatpush3.bf16.msra.mxu1 %v2037_v44 }
 0x245   : > { %1897 = vmatprep.subr.bf16.mxu1 %v2038_v46 }
 0x248   : > { %1898 = vmatpush3.bf16.msra.mxu1 %v2038_v46 }
 0x249   : > { %1899 = vmatprep.subr.bf16.mxu1 %v2039_v47 }
 0x24c   : > { %1900 = vmatpush3.bf16.msra.mxu1 %v2039_v47 }
 0x24f   : > { %1902 = vmatmul.mubr.msk.bf16.vlgmr.msra.gmra.mrb[16].mxu1 %vm608_vm2, %v1379_v42 }
 0x2d9   : > { %v1819_v48 = vpop.f32.mrb[4].mxu0 }
 0x2da   : > { %v727_v49 = vpop.f32.mrb[5].mxu0 }
 0x2db   : > { %v1820_v50 = vpop.f32.mrb[6].mxu0 }
 0x2dc   : > { %v730_v51 = vpop.f32.mrb[7].mxu0 }
 0x2e2   : > { %v1807_v52 = vpop.f32.mrb[0].mxu1 }
 0x2e3   : > { %v736_v53 = vadd.f32 %v1819_v48, %v1807_v52  ;;  %v649_v54 = vpop.f32.mrb[1].mxu1 }
 0x2e4   : > { %v728_v55 = vadd.f32 %v727_v49, %v649_v54  ;;  %v1808_v56 = vpop.f32.mrb[2].mxu1 }
 0x2e5   : > { %v652_v57 = vpop.f32.mrb[3].mxu1 }
 0x2e6   : > { %v731_v34 = vadd.f32 %v730_v51, %v652_v57 }
 0x2e9   : > { %v1843_v58 = vpop.f32.mrb[8].mxu0 }
 0x2ea   : > { %v924_v59 = vpop.f32.mrb[9].mxu0 }
 0x2eb   : > { %v1844_v60 = vpop.f32.mrb[10].mxu0 }
 0x2ec   : > { %v927_v61 = vpop.f32.mrb[11].mxu0 }
 0x2f2   : > { %v1831_v62 = vpop.f32.mrb[4].mxu1 }
 0x2f3   : > { %v838_v63 = vadd.f32 %v1831_v62, %v736_v53  ;;  %v822_v0 = vpop.f32.mrb[5].mxu1 }
 0x2f4   : > { %v836_v1 = vadd.f32 %v822_v0, %v728_v55  ;;  %v1832_v2 = vpop.f32.mrb[6].mxu1 }
 0x2f5   : > { %v825_v3 = vpop.f32.mrb[7].mxu1  ;;  %v940_v4 = vadd.f32 %v1843_v58, %v838_v63 }
 0x2f6   : > { %v837_v5 = vadd.f32 %v825_v3, %v731_v34  ;;  %v938_v6 = vadd.f32 %v924_v59, %v836_v1 }
 0x2f8   : > { %v939_v7 = vadd.f32 %v927_v61, %v837_v5 }
 0x2f9   : > { %v1867_v8 = vpop.f32.mrb[12].mxu0 }
 0x2fa   : > { %v1128_v9 = vpop.f32.mrb[13].mxu0 }
 0x2fb   : > { %v1868_v10 = vpop.f32.mrb[14].mxu0 }
 0x2fc   : > { %v1131_v11 = vpop.f32.mrb[15].mxu0 }
 0x302   : > { %v1855_v12 = vpop.f32.mrb[8].mxu1 }
 0x303   : > { %v1052_v13 = vadd.f32 %v1855_v12, %v940_v4  ;;  %v1036_v14 = vpop.f32.mrb[9].mxu1 }
 0x304   : > { %v1050_v15 = vadd.f32 %v1036_v14, %v938_v6  ;;  %v1856_v16 = vpop.f32.mrb[10].mxu1 }
 0x305   : > { %v1039_v17 = vpop.f32.mrb[11].mxu1  ;;  %v1144_v18 = vadd.f32 %v1867_v8, %v1052_v13 }
 0x306   : > { %v1051_v19 = vadd.f32 %v1039_v17, %v939_v7  ;;  %v1142_v20 = vadd.f32 %v1128_v9, %v1050_v15 }
 0x308   : > { %v1143_v21 = vadd.f32 %v1131_v11, %v1051_v19 }
 0x309   : > { %v1891_v22 = vpop.f32.mrb[16].mxu0 }
 0x30a   : > { %v1348_v23 = vpop.f32.mrb[17].mxu0 }
 0x30b   : > { %v1892_v24 = vpop.f32.mrb[18].mxu0 }
 0x30c   : > { %v1351_v25 = vpop.f32.mrb[19].mxu0 }
 0x312   : > { %v1879_v26 = vpop.f32.mrb[12].mxu1 }
 0x313   : > { %v1252_v27 = vadd.f32 %v1879_v26, %v1144_v18  ;;  %v1236_v28 = vpop.f32.mrb[13].mxu1 }
 0x314   : > { %v1250_v29 = vadd.f32 %v1236_v28, %v1142_v20  ;;  %v1880_v30 = vpop.f32.mrb[14].mxu1 }
 0x315   : > { %v1239_v31 = vpop.f32.mrb[15].mxu1  ;;  %v1364_v33 = vadd.f32 %v1891_v22, %v1252_v27 }
 0x316   : > { %v1251_v35 = vadd.f32 %v1239_v31, %v1143_v21  ;;  %v1362_v36 = vadd.f32 %v1348_v23, %v1250_v29 }
 0x318   : > { %v1363_v37 = vadd.f32 %v1351_v25, %v1251_v35 }
 0x322   : > { %v1903_v38 = vpop.f32.mrb[16].mxu1 }
 0x323   : > { %v1461_v40 = vadd.f32 %v1903_v38, %v1364_v33  ;;  %v1445_v41 = vpop.f32.mrb[17].mxu1 }
 0x324   : > { %v1459_v32 = vadd.f32 %v1445_v41, %v1362_v36  ;;  %v1904_v42 = vpop.f32.mrb[18].mxu1 }
 0x325   : > { %v1471_v43 = vadd.f32 %v1718_v39, %v1461_v40  ;;  %v1448_v44 = vpop.f32.mrb[19].mxu1 }
 0x326   : > { %v1469_v45 = vadd.f32 %v1718_v39, %v1459_v32  ;;  %v1460_v46 = vadd.f32 %v1448_v44, %v1363_v37 }
 0x327   : > { %vm1474_vm9 = vcmp.ge.f32.partialorder %v1471_v43, 0.0  ;;  %v1477_v47 = vmul.f32 0.01, %v1471_v43 }
 0x328   : > { %vm1472_vm10 = vcmp.ge.f32.partialorder %v1469_v45, 0.0  ;;  %v1475_v48 = vmul.f32 0.01, %v1469_v45  ;;  %v1470_v49 = vadd.f32 %v1718_v39, %v1460_v46 }
 0x329   : > { %v1480_v50 = vsel %vm1474_vm9, %v1471_v43, %v1477_v47 }
 0x32a   : > { %v1731_v51 = vpack.c.bf16 %v1480_v50, %v1480_v50  ;;  %v1478_v52 = vsel %vm1472_vm10, %v1469_v45, %v1475_v48  ;;  %vm1473_vm12 = vcmp.ge.f32.partialorder %v1470_v49, 0.0  ;;  %v1476_v53 = vmul.f32 0.01, %v1470_v49 }
 0x32b   : > { %v1729_v54 = vpack.c.bf16 %v1478_v52, %v1478_v52 }
 0x32c   : > { %1497 = vst.msk [vmem:[%s338_s20 + $0x8] sm:$0xf] %vm340_vm1, %v1731_v51  ;;  %v1479_v55 = vsel %vm1473_vm12, %v1470_v49, %v1476_v53 }
 0x32d   : > { %1495 = vst.msk [vmem:[%s338_s20] sm:$0xf] %vm340_vm1, %v1729_v54  ;;  %v1730_v56 = vpack.c.bf16 %v1479_v55, %v1479_v55 }
 0x32f   : > { %1496 = vst.msk [vmem:[%s338_s20 + $0x4] sm:$0xf] %vm340_vm1, %v1730_v56 }
 0x330   : > { %2169 = shalt.err (!%p2166_p7)
}
 0x331   : > { %s2170_s29 = scalar_lea.hbm %s2670_s10, 192  ;;  %s2174_s15 = scalar_lea.hbm %s2724_s6, 384 }
 0x332   : > { %p2171_p9 = scmp.ne.s32.totalorder %s2670_s10, %s2170_s29  ;;  %p2175_p11 = scmp.lt.u32.totalorder %s2670_s10, %s2724_s6 }
 0x333   : > { %p2176_p2 = scmp.lt.u32.totalorder %s2174_s15, %s2170_s29  ;;  %p2178_p1 = scmp.lt.u32.totalorder %s2170_s29, %s2670_s10 }
 0x334   : > { %p2172_p0 = pnand %p2171_p9, %p2764_p13 }
 0x335   : > { %p2177_p12 = por %p2176_p2, %p2175_p11 }
 0x336   : > { %p2173_p8 = pneg %p2172_p0 }
 0x337   : > { %p2179_p6 = por %p2178_p1, %p2177_p12 }
 0x339   : > { %p2180_p10 = pnand %p2179_p6, %p2173_p8 }
 0x33b   : > { %2183 = shalt.err (!%p2180_p10)
}
 0x33c   : > { %s2247_s4 = smov 64   ;;  %s2248_s13 = smov 4  }
 0x33d   : > { %1919 = dma.vmem_to_hbm [thread:$0]  (%p2764_p13), %s2673_s16, 192, %s2670_s10, %s1499_s25, %s2247_s4, %s2247_s4, %s2248_s13  }
 0x33e PF: > { %s1527_s20 = sand.u32 1, %s2222_s21   ;;  %p2765_p4 = scmp.ne.s32.totalorder %s2736_s28, 0 }
 0x33f   : > { %p2766_p5 = scmp.ge.s32.totalorder %s2234_s24, 2  ;;  %s1528_s17 = scalar_lea.sflag [#allocation6], %s1527_s20 }
 0x341   : > { %p1936_p3 = pnand %p2766_p5, %p2765_p4 }
 0x343   : > { %2217 = dma.done.wait (!%p1936_p3), %s1528_s17, 192  }
 0x344   : > { %2219 = vsyncadd (!%p1936_p3), %s1528_s17, 4294967104  ;;  %p23_p7 = scmp.ge.s32.totalorder %s2400_s8, 4   ;;  %s2767_s21 = smov %s2226_s22 }
 0x345   : > { %s2768_s22 = smov %s2230_s23  ;;  %s2769_s23 = smov %s2416_s11 }
 0x346   : > { %s2770_s24 = smov %s2400_s8  ;;  %25 = sbr.rel (!%p23_p7) target bundleno = 12 (0xc), region = 118 }
 0x34d   :  { %1533 = vsyncpa [#allocation5], 1 }
 0x34e   :  { %1535 = vsyncpa [#allocation5 + $0x1], 1 }
 0x34f   :  { %1536 = vsyncpa [#allocation8], 1 }
 0x350   :  { %1538 = vsyncpa [#allocation8 + $0x1], 1 }
 0x351   :  { %1539 = vsyncpa [#allocation11], 1 }
 0x352   :  { %1540 = vsyncpa [#allocation6], 1 }
 0x353   :  { %1542 = vsyncpa [#allocation6 + $0x1], 1 }

</bundles_post_ra>
